<compile_context>
chip_gen: v7x
topology: tpu7x:2x2x1
jax: 0.10.0
libtpu: 0.0.40
codegen_flags: <defaults>
</compile_context>

<pallas_src>
import math

import jax
import jax.numpy as jnp
from jax.experimental import pallas as pl
from jax.experimental.pallas import tpu as pltpu


def _scale_objects_kernel(scale_ref, x_ref, o_ref):
    # scale_ref: (1, L) constant scale row; x_ref/o_ref: (TR, L) tiles.
    # Single broadcast multiply -> one vmul per vreg, no iota/compare/select.
    o_ref[...] = x_ref[...] * scale_ref[...]


def _round_up(x: int, m: int) -> int:
    return ((x + m - 1) // m) * m


def scale_objects(
    objects: jax.Array,
    scale: int = 4,
    num_scaled: int = 4,
    *,
    force_pallas: bool = False,
    min_pallas_elements: int = 1 << 16,
) -> jax.Array:
    """Pallas equivalent of ScaleObjects.forward (returns a new array)."""
    b, n, d = objects.shape
    total = b * n * d

    # Per-position scale pattern over the last dim: [s]*num_scaled + [1]*(d-num_scaled).
    period = [scale] * num_scaled + [1] * (d - num_scaled)

    # Tiny problems: a pallas_call's fixed launch/pipeline overhead dwarfs the
    # work -- let XLA fuse a single elementwise multiply instead.
    if total < min_pallas_elements and not force_pallas:
        return objects * jnp.asarray(period, dtype=objects.dtype)

    # Lane-dense relayout: view the flat data as (rows, L) with L a multiple of
    # both 128 (full lanes, unmasked stores) and d (period-6 pattern aligns
    # identically on every row).
    lane_width = math.lcm(d, 128)                      # 384 for d == 6
    rows = pl.cdiv(total, lane_width)

    # Rows per grid step: multiple of 8 (sublane tiling), capped so each
    # buffer is ~1.5 MiB for f32 (4 double-buffered buffers fit v7x VMEM).
    tr = min(1024, _round_up(rows, 8))
    rows_padded = _round_up(rows, tr)
    grid = rows_padded // tr

    padded_total = rows_padded * lane_width
    flat = objects.reshape(-1)
    if padded_total != total:
        flat = jnp.pad(flat, (0, padded_total - total))
    x2d = flat.reshape(rows_padded, lane_width)

    scale_row = jnp.tile(
        jnp.asarray(period, dtype=objects.dtype), lane_width // d
    ).reshape(1, lane_width)

    out2d = pl.pallas_call(
        _scale_objects_kernel,
        out_shape=jax.ShapeDtypeStruct((rows_padded, lane_width), objects.dtype),
        grid=(grid,),
        in_specs=[
            pl.BlockSpec((1, lane_width), lambda i: (0, 0)),   # constant scale row
            pl.BlockSpec((tr, lane_width), lambda i: (i, 0)),  # data tile
        ],
        out_specs=pl.BlockSpec((tr, lane_width), lambda i: (i, 0)),
        input_output_aliases={1: 0},  # write the result over the padded slab
        compiler_params=pltpu.CompilerParams(
            dimension_semantics=("parallel",),
        ),
    )(scale_row, x2d)

    return out2d.reshape(-1)[:total].reshape(b, n, d)


if __name__ == "__main__":
    key = jax.random.PRNGKey(0)
    B, N, D = 2, 8, 6  # (batch, num_objects, 6) as implied by the module
    SCALE = 4

    objects = jax.random.normal(key, (B, N, D), dtype=jnp.float32)

    # Force the Pallas path even at this tiny size so the kernel itself runs.
    out = scale_objects(objects, scale=SCALE, force_pallas=True)
    out = jax.block_until_ready(out)

    # Reference check against the PyTorch forward semantics.
    ref = objects.at[:, :, :4].multiply(SCALE)
    assert out.shape == (B, N, D)
    assert out.dtype == objects.dtype
    assert jnp.allclose(out, ref, atol=1e-6), "mismatch vs reference"

    # Also sanity-check the small-size XLA fallback path.
    out_small = jax.block_until_ready(scale_objects(objects, scale=SCALE))
    assert jnp.allclose(out_small, ref, atol=1e-6), "fallback mismatch vs reference"

    print("KERNEL_OK")
</pallas_src>

<mosaic_0001>
module attributes {stable_mosaic.version = 11 : i64} {
  func.func @_scale_objects_kernel(%arg0: i32, %arg1: memref<1x384xf32, #tpu.memory_space<vmem>>, %arg2: memref<8x384xf32, #tpu.memory_space<vmem>>, %arg3: memref<8x384xf32, #tpu.memory_space<vmem>>) attributes {dimension_semantics = [#tpu.dimension_semantics<parallel>], iteration_bounds = array<i64: 1>, scalar_prefetch = 0 : i64, scratch_operands = 0 : i64, tpu.core_type = #tpu.core_type<tc>, window_params = [{pipeline_mode = #tpu.pipeline_mode<synchronous>, transform_indices = @transform_0, window_bounds = array<i64: 1, 384>}, {transform_indices = @transform_1, window_bounds = array<i64: 8, 384>}, {transform_indices = @transform_2, window_bounds = array<i64: 8, 384>}]} {
    %c0 = arith.constant 0 : index
    %c0_0 = arith.constant 0 : index
    %0 = vector.load %arg2[%c0, %c0_0] : memref<8x384xf32, #tpu.memory_space<vmem>>, vector<8x384xf32>
    %c0_1 = arith.constant 0 : index
    %c0_2 = arith.constant 0 : index
    %1 = vector.load %arg1[%c0_1, %c0_2] : memref<1x384xf32, #tpu.memory_space<vmem>>, vector<1x384xf32>
    %2 = vector.broadcast %1 : vector<1x384xf32> to vector<8x384xf32>
    %3 = arith.mulf %0, %2 : vector<8x384xf32>
    %c0_3 = arith.constant 0 : index
    %c0_4 = arith.constant 0 : index
    %4 = vector.load %arg3[%c0_3, %c0_4] : memref<8x384xf32, #tpu.memory_space<vmem>>, vector<8x384xf32>
    tpu.vector_store %arg3[%c0_3, %c0_4], %3 {strides = array<i32>} : memref<8x384xf32, #tpu.memory_space<vmem>>, vector<8x384xf32>,
    return
  }
  func.func @transform_0(%arg0: i32) -> (i32, i32) {
    %c0_i32 = arith.constant 0 : i32
    %c0_i32_0 = arith.constant 0 : i32
    %c0_i32_1 = arith.constant 0 : i32
    return %c0_i32, %c0_i32_0 : i32, i32
  }
  func.func @transform_1(%arg0: i32) -> (i32, i32) {
    %c0_i32 = arith.constant 0 : i32
    %c0_i32_0 = arith.constant 0 : i32
    return %arg0, %c0_i32 : i32, i32
  }
  func.func @transform_2(%arg0: i32) -> (i32, i32) {
    %c0_i32 = arith.constant 0 : i32
    %c0_i32_0 = arith.constant 0 : i32
    return %arg0, %c0_i32 : i32, i32
  }
}

</mosaic_0001>

<bundles_post_ra>
// kernel: tpu_custom_call.1
= control target key start
LH: loop header
LB: loop body
LE: loop exit
PB: predicated region body
PF: predicated region fallthrough
CT: control target
= control target key end

     0   :  { %7 = vsyncpa [#allocation3], 0  ;;  %s159_s0 = inlined_call_operand.vmem [shape: f32[1,384], index: 0, kind: input, shape index: {}]   ;;  %s160_s1 = inlined_call_operand.hbm [shape: f32[8,384], index: 1, kind: input, shape index: {}, may-alias: {1,2}]   ;;  %s161_s2 = inlined_call_operand.hbm [shape: f32[8,384], index: 2, kind: output, shape index: {}, may-alias: {1,2}]  }
   0x1   :  { %8 = vsyncpa [#allocation4], 0  ;;  %s115_s9 = smov [#allocation2]   ;;  %s67_s13 = scalar_lea.hbm %s160_s1, 384 }
   0x2   :  { %s17_s10 = sshll.u32 %s115_s9, 4  ;;  %p68_p0 = scmp.ne.s32.totalorder %s160_s1, %s67_s13  ;;  %s18_s10 = int_to_ptr.vmem [resolvable:$true] %s17_s10 }
   0x3   :  { %p71_p1 = scmp.lt.u32.totalorder %s67_s13, %s160_s1 }
   0x5   :  { %p73_p2 = pnand %p71_p1, %p68_p0 }
   0x7   :  { %76 = shalt.err (!%p73_p2)
}
   0x8   :  { %s77_s18 = scalar_lea.vmem %s18_s10, 384  ;;  %p82_p4 = scmp.lt.s32.totalorder %s18_s10, %s18_s10 }
   0x9   :  { %p78_p3 = scmp.ne.s32.totalorder %s18_s10, %s77_s18  ;;  %p83_p5 = scmp.lt.s32.totalorder %s77_s18, %s77_s18 }
   0xb   :  { %p84_p6 = por %p83_p5, %p82_p4 }
   0xd   :  { %p85_p7 = pnand %p84_p6, %p78_p3 }
   0xf   :  { %88 = shalt.err (!%p85_p7)
}
  0x10   :  { %20 = dma.hbm_to_vmem [thread:$0]  %s160_s1, 384, %s18_s10, [#allocation3]  }
  0x11   :  { %111 = dma.done.wait [#allocation3], 384  }
  0x12   :  { %112 = vsyncadd [#allocation3], 4294966912  ;;  %v29_v0 = vlaneseq  ;;  %v24_v5 = vld [vmem:[#allocation2] sm:$0xff]  ;;  %v25_v7 = vld [vmem:[#allocation2 + $0x8] sm:$0xff]  ;;  %s116_s23 = smov [#allocation5]  }
  0x13   :  { %v27_v6 = vld [vmem:[%s159_s0] sm:$0x7]  ;;  %s56_s24 = sshll.u32 %s116_s23, 4  ;;  %v26_v10 = vld [vmem:[#allocation2 + $0x10] sm:$0xff]  ;;  %s57_s24 = int_to_ptr.vmem [resolvable:$true] %s56_s24 }
  0x14   :  { %v30_v1 = vshrl.u32 %v29_v0, 7  ;;  %s89_s1 = scalar_lea.vmem %s57_s24, 384  ;;  %p94_p9 = scmp.lt.s32.totalorder %s57_s24, %s57_s24 }
  0x15   :  { %p90_p8 = scmp.ne.s32.totalorder %s57_s24, %s89_s1  ;;  %p95_p10 = scmp.lt.s32.totalorder %s89_s1, %s89_s1 }
  0x16   :  { %v31_v2 = vsub.s32 0, %v30_v1  ;;  %v35_v3 = vsub.s32 1, %v30_v1  ;;  %v39_v4 = vsub.s32 2, %v30_v1 }
  0x17   :  { %p96_p11 = por %p95_p10, %p94_p9 }
  0x18   :  { %v32_v8 = vrot.slane %v27_v6, %v31_v2  ;;  %v36_v9 = vrot.slane %v27_v6, %v35_v3  ;;  %v40_v11 = vrot.slane %v27_v6, %v39_v4 }
  0x19   :  { %p97_p12 = pnand %p96_p11, %p90_p8 }
  0x1a   :  { %v44_v12 = vmul.f32 %v32_v8, %v24_v5  ;;  %v45_v13 = vmul.f32 %v36_v9, %v25_v7  ;;  %v46_v14 = vmul.f32 %v40_v11, %v26_v10 }
  0x1c   :  { %47 = vst [vmem:[#allocation5] sm:$0xff] %v44_v12  ;;  %48 = vst [vmem:[#allocation5 + $0x8] sm:$0xff] %v45_v13 }
  0x1d   :  { %49 = vst [vmem:[#allocation5 + $0x10] sm:$0xff] %v46_v14 }
  0x1e   :  { %100 = shalt.err (!%p97_p12)
}
  0x1f   :  { %s101_s26 = scalar_lea.hbm %s161_s2, 384 }
  0x20   :  { %p102_p13 = scmp.ne.s32.totalorder %s161_s2, %s101_s26  ;;  %p105_p0 = scmp.lt.u32.totalorder %s101_s26, %s161_s2 }
  0x22   :  { %p107_p1 = pnand %p105_p0, %p102_p13 }
  0x24   :  { %110 = shalt.err (!%p107_p1)
}
  0x25   :  { %59 = dma.vmem_to_hbm [thread:$0]  %s57_s24, 384, %s161_s2, [#allocation4]  }
  0x26   :  { %113 = dma.done.wait [#allocation4], 384  }
  0x27   :  { %114 = vsyncadd [#allocation4], 4294966912 }
  0x28   :  { %63 = vsyncpa [#allocation3], 1 }
  0x29   :  { %64 = vsyncpa [#allocation4], 1 }

</bundles_post_ra>
